<compile_context>
chip_gen: v7x
topology: tpu7x:2x2x1
jax: 0.10.0
libtpu: 0.0.40
codegen_flags: <defaults>
</compile_context>

<pallas_src>
import math

import jax
import jax.numpy as jnp
from jax.experimental import pallas as pl
from jax.experimental.pallas import tpu as pltpu

_LANES = 128                    # vreg lane width (identical on v5e / v6e / v7x)
_TARGET_BLOCK_BYTES = 2 << 20   # ~2 MiB per block; 3 operands double-buffered
                                # ~= 12 MiB, under every generation's default
                                # scoped-VMEM limit (no vmem_limit_bytes needed)


def _add_kernel(x_ref, pos_ref, o_ref):
    # x_ref / pos_ref / o_ref: (tr, 128) -> pure same-shape VPU add.
    o_ref[...] = x_ref[...] + pos_ref[...]


def _add_batched_kernel(x_ref, pos_ref, o_ref):
    # x_ref / o_ref: (tb, tr, 128); pos_ref: (tr, 128) broadcast over batch.
    o_ref[...] = x_ref[...] + pos_ref[...][None, :, :]


def _add_unaligned_kernel(x_ref, pos_ref, o_ref):
    # Rare fallback when prod(seq dims) is not a multiple of 128.
    o_ref[...] = x_ref[...] + pos_ref[...]


def _pick_row_tile(num_rows: int, itemsize: int) -> int:
    """Largest row tile (multiple of 8, or the full extent) within the byte budget."""
    max_rows = max(8, _TARGET_BLOCK_BYTES // (_LANES * itemsize))
    if num_rows <= max_rows:
        return num_rows
    start = max_rows - (max_rows % 8)
    for tr in range(start, 7, -8):          # multiples of 8 keep blocks sublane-aligned
        if num_rows % tr == 0:
            return tr
    return num_rows                          # no aligned divisor: take the full extent


def rand_init_positional_encoding(token_embeddings: jax.Array,
                                  pos_emb: jax.Array) -> jax.Array:
    """token_embeddings: (B, *block_shape, n_embd); pos_emb: (1, *block_shape, n_embd)."""
    if pos_emb.ndim == token_embeddings.ndim:
        pos_emb = jnp.squeeze(pos_emb, axis=0)   # drop broadcast batch dim (glue)

    x = token_embeddings
    batch = x.shape[0]
    seq_shape = tuple(x.shape[1:])
    assert pos_emb.shape == seq_shape, (pos_emb.shape, seq_shape)

    n = math.prod(seq_shape)
    dtype = x.dtype
    itemsize = x.dtype.itemsize

    if n % _LANES != 0:
        # TODO(synk): tile this unaligned path if such shapes ever become large.
        x2 = x.reshape(batch, n)
        p2 = pos_emb.reshape(1, n)
        out = pl.pallas_call(
            _add_unaligned_kernel,
            out_shape=jax.ShapeDtypeStruct((batch, n), dtype),
            grid_spec=pltpu.PrefetchScalarGridSpec(
                num_scalar_prefetch=0,
                grid=(1,),
                in_specs=[pl.BlockSpec((batch, n), lambda i: (0, 0)),
                          pl.BlockSpec((1, n), lambda i: (0, 0))],
                out_specs=pl.BlockSpec((batch, n), lambda i: (0, 0)),
            ),
        )(x2, p2)
        return out.reshape(x.shape)

    rows = n // _LANES
    tr = _pick_row_tile(rows, itemsize)
    num_row_tiles = rows // tr

    # Free row-major re-views; last dim is now lane-dense (128).
    x3 = x.reshape(batch, rows, _LANES)
    p3 = pos_emb.reshape(rows, _LANES)

    if batch * tr * _LANES * itemsize <= _TARGET_BLOCK_BYTES:
        # Small problem: fold the whole batch into one block -> minimal grid steps.
        grid = (num_row_tiles,)
        in_specs = [
            pl.BlockSpec((batch, tr, _LANES), lambda r: (0, r, 0)),
            pl.BlockSpec((tr, _LANES), lambda r: (r, 0)),
        ]
        out_specs = pl.BlockSpec((batch, tr, _LANES), lambda r: (0, r, 0))
        kernel = _add_batched_kernel
        dims = ("parallel",)
    else:
        # Large problem: one batch row per step, batch innermost so the pos tile
        # stays resident (re-DMA'd only when the row tile changes).
        grid = (num_row_tiles, batch)
        in_specs = [
            pl.BlockSpec((pl.Squeezed(), tr, _LANES), lambda r, b: (b, r, 0)),
            pl.BlockSpec((tr, _LANES), lambda r, b: (r, 0)),
        ]
        out_specs = pl.BlockSpec((pl.Squeezed(), tr, _LANES), lambda r, b: (b, r, 0))
        kernel = _add_kernel
        dims = ("parallel", "parallel")

    out = pl.pallas_call(
        kernel,
        out_shape=jax.ShapeDtypeStruct((batch, rows, _LANES), dtype),
        grid_spec=pltpu.PrefetchScalarGridSpec(
            num_scalar_prefetch=0,
            grid=grid,
            in_specs=in_specs,
            out_specs=out_specs,
        ),
        compiler_params=pltpu.CompilerParams(dimension_semantics=dims),
    )(x3, p3)
    return out.reshape(x.shape)


if __name__ == "__main__":
    key = jax.random.PRNGKey(0)

    # --- Main check: module config block_shape=[8], n_embd=32, batch=2 -------
    B, S, D = 2, 8, 32
    k_x, k_pos = jax.random.split(key)
    pos_emb = jax.random.normal(k_pos, (1, S, D), dtype=jnp.float32)
    token_embeddings = jax.random.normal(k_x, (B, S, D), dtype=jnp.float32)

    out = jax.block_until_ready(
        rand_init_positional_encoding(token_embeddings, pos_emb))
    ref = token_embeddings + pos_emb
    assert out.shape == (B, S, D)
    assert jnp.allclose(out, ref, atol=1e-6), "mismatch vs reference (small path)"

    # --- Exercise the tiled (Squeezed batch, batch-innermost) path -----------
    B2, S2, D2 = 5, 128, 1024
    k_x2, k_pos2 = jax.random.split(jax.random.PRNGKey(1))
    pos2 = jax.random.normal(k_pos2, (1, S2, D2), dtype=jnp.float32)
    tok2 = jax.random.normal(k_x2, (B2, S2, D2), dtype=jnp.float32)
    out2 = jax.block_until_ready(rand_init_positional_encoding(tok2, pos2))
    assert jnp.allclose(out2, tok2 + pos2, atol=1e-6), "mismatch (tiled path)"

    # --- Exercise the non-128-aligned fallback path ---------------------------
    B3, S3, D3 = 2, 8, 24
    k_x3, k_pos3 = jax.random.split(jax.random.PRNGKey(2))
    pos3 = jax.random.normal(k_pos3, (1, S3, D3), dtype=jnp.float32)
    tok3 = jax.random.normal(k_x3, (B3, S3, D3), dtype=jnp.float32)
    out3 = jax.block_until_ready(rand_init_positional_encoding(tok3, pos3))
    assert jnp.allclose(out3, tok3 + pos3, atol=1e-6), "mismatch (unaligned path)"

    print("KERNEL_OK")
</pallas_src>

<mosaic_0001>
module attributes {stable_mosaic.version = 11 : i64} {
  func.func @_add_batched_kernel(%arg0: i32, %arg1: memref<2x2x128xf32, #tpu.memory_space<vmem>>, %arg2: memref<2x128xf32, #tpu.memory_space<vmem>>, %arg3: memref<2x2x128xf32, #tpu.memory_space<vmem>>) attributes {dimension_semantics = [#tpu.dimension_semantics<parallel>], iteration_bounds = array<i64: 1>, scalar_prefetch = 0 : i64, scratch_operands = 0 : i64, tpu.core_type = #tpu.core_type<tc>, window_params = [{transform_indices = @transform_0, window_bounds = array<i64: 2, 2, 128>}, {transform_indices = @transform_1, window_bounds = array<i64: 2, 128>}, {transform_indices = @transform_2, window_bounds = array<i64: 2, 2, 128>}]} {
    %c0 = arith.constant 0 : index
    %c0_0 = arith.constant 0 : index
    %c0_1 = arith.constant 0 : index
    %0 = vector.load %arg1[%c0, %c0_0, %c0_1] : memref<2x2x128xf32, #tpu.memory_space<vmem>>, vector<2x2x128xf32>
    %c0_2 = arith.constant 0 : index
    %c0_3 = arith.constant 0 : index
    %1 = vector.load %arg2[%c0_2, %c0_3] : memref<2x128xf32, #tpu.memory_space<vmem>>, vector<2x128xf32>
    %2 = vector.shape_cast %1 : vector<2x128xf32> to vector<1x2x128xf32>
    %3 = vector.broadcast %2 : vector<1x2x128xf32> to vector<2x2x128xf32>
    %4 = arith.addf %0, %3 : vector<2x2x128xf32>
    %c0_4 = arith.constant 0 : index
    %c0_5 = arith.constant 0 : index
    %c0_6 = arith.constant 0 : index
    %5 = vector.load %arg3[%c0_4, %c0_5, %c0_6] : memref<2x2x128xf32, #tpu.memory_space<vmem>>, vector<2x2x128xf32>
    tpu.vector_store %arg3[%c0_4, %c0_5, %c0_6], %4 {strides = array<i32>} : memref<2x2x128xf32, #tpu.memory_space<vmem>>, vector<2x2x128xf32>,
    return
  }
  func.func @transform_0(%arg0: i32) -> (i32, i32, i32) {
    %c0_i32 = arith.constant 0 : i32
    %c0_i32_0 = arith.constant 0 : i32
    %c0_i32_1 = arith.constant 0 : i32
    return %c0_i32, %arg0, %c0_i32_0 : i32, i32, i32
  }
  func.func @transform_1(%arg0: i32) -> (i32, i32) {
    %c0_i32 = arith.constant 0 : i32
    %c0_i32_0 = arith.constant 0 : i32
    return %arg0, %c0_i32 : i32, i32
  }
  func.func @transform_2(%arg0: i32) -> (i32, i32, i32) {
    %c0_i32 = arith.constant 0 : i32
    %c0_i32_0 = arith.constant 0 : i32
    %c0_i32_1 = arith.constant 0 : i32
    return %c0_i32, %arg0, %c0_i32_0 : i32, i32, i32
  }
}

</mosaic_0001>

<bundles_post_ra>
// kernel: tpu_custom_call.1
= control target key start
LH: loop header
LB: loop body
LE: loop exit
PB: predicated region body
PF: predicated region fallthrough
CT: control target
= control target key end

     0   :  { %7 = vsyncpa [#allocation3], 0  ;;  %s154_s0 = inlined_call_operand.hbm [shape: f32[2,2,128], index: 0, kind: input, shape index: {}]   ;;  %s155_s1 = inlined_call_operand.vmem [shape: f32[2,128], index: 1, kind: input, shape index: {}]   ;;  %s156_s2 = inlined_call_operand.hbm [shape: f32[2,2,128], index: 2, kind: output, shape index: {}]  }
   0x1   :  { %8 = vsyncpa [#allocation4], 0  ;;  %s102_s9 = smov [#allocation2]   ;;  %s54_s13 = scalar_lea.hbm %s154_s0, 64 }
   0x2   :  { %s14_s10 = sshll.u32 %s102_s9, 4  ;;  %p55_p0 = scmp.ne.s32.totalorder %s154_s0, %s54_s13  ;;  %s15_s10 = int_to_ptr.vmem [resolvable:$true] %s14_s10 }
   0x3   :  { %p58_p1 = scmp.lt.u32.totalorder %s54_s13, %s154_s0 }
   0x5   :  { %p60_p2 = pnand %p58_p1, %p55_p0 }
   0x7   :  { %63 = shalt.err (!%p60_p2)
}
   0x8   :  { %s64_s18 = scalar_lea.vmem %s15_s10, 64  ;;  %p69_p4 = scmp.lt.s32.totalorder %s15_s10, %s15_s10 }
   0x9   :  { %p65_p3 = scmp.ne.s32.totalorder %s15_s10, %s64_s18  ;;  %p70_p5 = scmp.lt.s32.totalorder %s64_s18, %s64_s18 }
   0xb   :  { %p71_p6 = por %p70_p5, %p69_p4 }
   0xd   :  { %p72_p7 = pnand %p71_p6, %p65_p3 }
   0xf   :  { %75 = shalt.err (!%p72_p7)
}
  0x10   :  { %s103_s19 = smov 32   ;;  %s104_s20 = smov 2  }
  0x11   :  { %20 = dma.hbm_to_vmem [thread:$0]  %s154_s0, 64, %s15_s10, [#allocation3], %s103_s19, %s103_s19, %s104_s20  }
  0x12   :  { %98 = dma.done.wait [#allocation3], 64  }
  0x13   :  { %99 = vsyncadd [#allocation3], 4294967232  ;;  %s105_s23 = smov [#allocation5]   ;;  %v26_v0 = vld [vmem:[#allocation2] sm:$0x3] }
  0x14   :  { %s38_s24 = sshll.u32 %s105_s23, 4  ;;  %v28_v1 = vld [vmem:[%s155_s1] sm:$0x3]  ;;  %v27_v2 = vld [vmem:[#allocation2 + $0x2] sm:$0x3]  ;;  %s39_s24 = int_to_ptr.vmem [resolvable:$true] %s38_s24 }
  0x15   :  { %v29_v3 = vadd.f32 %v28_v1, %v26_v0  ;;  %v30_v4 = vadd.f32 %v28_v1, %v27_v2  ;;  %s76_s27 = scalar_lea.vmem %s39_s24, 64  ;;  %p81_p9 = scmp.lt.s32.totalorder %s39_s24, %s39_s24 }
  0x16   :  { %p77_p8 = scmp.ne.s32.totalorder %s39_s24, %s76_s27  ;;  %p82_p10 = scmp.lt.s32.totalorder %s76_s27, %s76_s27 }
  0x17   :  { %31 = vst [vmem:[#allocation5] sm:$0x3] %v29_v3  ;;  %32 = vst [vmem:[#allocation5 + $0x2] sm:$0x3] %v30_v4 }
  0x18   :  { %p83_p11 = por %p82_p10, %p81_p9 }
  0x1a   :  { %p84_p12 = pnand %p83_p11, %p77_p8 }
  0x1c   :  { %87 = shalt.err (!%p84_p12)
}
  0x1d   :  { %s88_s29 = scalar_lea.hbm %s156_s2, 64 }
  0x1e   :  { %p89_p13 = scmp.ne.s32.totalorder %s156_s2, %s88_s29  ;;  %p92_p0 = scmp.lt.u32.totalorder %s88_s29, %s156_s2 }
  0x20   :  { %p94_p1 = pnand %p92_p0, %p89_p13 }
  0x22   :  { %97 = shalt.err (!%p94_p1)
}
  0x23   :  { %44 = dma.vmem_to_hbm [thread:$0]  %s39_s24, 64, %s156_s2, [#allocation4], %s103_s19, %s103_s19, %s104_s20  }
  0x24   :  { %100 = dma.done.wait [#allocation4], 64  }
  0x25   :  { %101 = vsyncadd [#allocation4], 4294967232 }
  0x26   :  { %48 = vsyncpa [#allocation3], 1 }
  0x27   :  { %49 = vsyncpa [#allocation4], 1 }

</bundles_post_ra>
